<compile_context>
chip_gen: v7x
topology: tpu7x:2x2x1
jax: 0.10.0
libtpu: 0.0.40
codegen_flags: <defaults>
</compile_context>

<pallas_src>
import math
from functools import partial

import jax
import jax.numpy as jnp
from jax import lax
from jax.experimental import pallas as pl
from jax.experimental.pallas import tpu as pltpu


def _sdpa_kernel(q_ref, k_ref, v_ref, o_ref, *, scale):
    # scale is a compile-time constant = 1.0 / inv_scale
    # (the torch module *divides* the logits by inv_scale).
    q = q_ref[...]                      # (B, D)
    k = k_ref[...]                      # (B, D)
    v = v_ref[...]                      # (B, D)

    # scaled_dot_product = (q @ k^T) * (1 / inv_scale)
    # Contract the D axes directly so k is consumed transposed by the MXU,
    # never materialized as a (D, B) lane-sparse tile.
    s = lax.dot_general(
        q, k,
        dimension_numbers=(((1,), (1,)), ((), ())),
        preferred_element_type=jnp.float32,
    ) * scale                           # (B, B)

    # numerically stable softmax over the last dim
    m = jnp.max(s, axis=-1, keepdims=True)
    e = jnp.exp(s - m)
    denom = jnp.sum(e, axis=-1, keepdims=True)
    p = e * pl.reciprocal(denom, approx=True)

    # attention_weights @ value
    o_ref[...] = jnp.dot(p, v, preferred_element_type=jnp.float32).astype(o_ref.dtype)


def scaled_dot_product_attention(query, key, value, inv_scale):
    """query/key/value: (B, 1, D) float32. Returns (B, D) float32."""
    q = jnp.squeeze(query, axis=1)
    k = jnp.squeeze(key, axis=1)
    v = jnp.squeeze(value, axis=1)
    B, D = q.shape

    scale = 1.0 / float(inv_scale)      # constant-folded at compile time

    vmem_spec = pl.BlockSpec(memory_space=pltpu.MemorySpace.VMEM)
    out = pl.pallas_call(
        partial(_sdpa_kernel, scale=scale),
        out_shape=jax.ShapeDtypeStruct((B, D), jnp.float32),
        in_specs=[vmem_spec, vmem_spec, vmem_spec],
        out_specs=vmem_spec,
    )(q, k, v)
    return out


def _reference(query, key, value, inv_scale):
    q = jnp.squeeze(query, axis=1)
    k = jnp.squeeze(key, axis=1)
    v = jnp.squeeze(value, axis=1)
    s = (q @ k.T) / inv_scale
    p = jax.nn.softmax(s, axis=-1)
    return p @ v


if __name__ == "__main__":
    B, D = 8, 256
    inv_scale = 1.0 / math.sqrt(D)

    key0 = jax.random.PRNGKey(0)
    kq, kk, kv = jax.random.split(key0, 3)
    query = jax.random.normal(kq, (B, 1, D), dtype=jnp.float32)
    key_t = jax.random.normal(kk, (B, 1, D), dtype=jnp.float32)
    value = jax.random.normal(kv, (B, 1, D), dtype=jnp.float32)

    out = scaled_dot_product_attention(query, key_t, value, inv_scale)
    out = jax.block_until_ready(out)

    ref = _reference(query, key_t, value, inv_scale)
    assert out.shape == (B, D)
    # approx reciprocal (EUP) in the softmax denom → slightly looser tolerance
    assert jnp.allclose(out, ref, atol=1e-3, rtol=1e-3), float(jnp.max(jnp.abs(out - ref)))

    print("KERNEL_OK")
</pallas_src>

<mosaic_0001>
module attributes {stable_mosaic.version = 11 : i64} {
  func.func @_sdpa_kernel(%arg0: memref<8x256xf32, #tpu.memory_space<vmem>>, %arg1: memref<8x256xf32, #tpu.memory_space<vmem>>, %arg2: memref<8x256xf32, #tpu.memory_space<vmem>>, %arg3: memref<8x256xf32, #tpu.memory_space<vmem>>) attributes {dimension_semantics = [], scalar_prefetch = 0 : i64, scratch_operands = 0 : i64, tpu.core_type = #tpu.core_type<tc>} {
    %c0 = arith.constant 0 : index
    %c0_0 = arith.constant 0 : index
    %0 = vector.load %arg0[%c0, %c0_0] : memref<8x256xf32, #tpu.memory_space<vmem>>, vector<8x256xf32>
    %c0_1 = arith.constant 0 : index
    %c0_2 = arith.constant 0 : index
    %1 = vector.load %arg1[%c0_1, %c0_2] : memref<8x256xf32, #tpu.memory_space<vmem>>, vector<8x256xf32>
    %c0_3 = arith.constant 0 : index
    %c0_4 = arith.constant 0 : index
    %2 = vector.load %arg2[%c0_3, %c0_4] : memref<8x256xf32, #tpu.memory_space<vmem>>, vector<8x256xf32>
    %cst = arith.constant dense<0.000000e+00> : vector<8x8xf32>
    %3 = tpu.matmul %0, %1, %cst {dimension_numbers = #tpu.dot_dimension_numbers<[1], [1], [0], [0], [0, 0, 1, 0], [], []>} : vector<8x256xf32>, vector<8x256xf32>, vector<8x8xf32> -> vector<8x8xf32>
    %cst_5 = arith.constant 1.600000e+01 : f32
    %4 = vector.broadcast %cst_5 : f32 to vector<8x8xf32>
    %5 = arith.mulf %3, %4 : vector<8x8xf32>
    %cst_6 = arith.constant dense<0xFF800000> : vector<8xf32>
    %6 = vector.multi_reduction <maximumf>, %5, %cst_6 [1] : vector<8x8xf32> to vector<8xf32>
    %7 = vector.shape_cast %6 : vector<8xf32> to vector<8x1xf32>
    %8 = vector.broadcast %7 : vector<8x1xf32> to vector<8x8xf32>
    %9 = arith.subf %5, %8 : vector<8x8xf32>
    %10 = math.exp %9 : vector<8x8xf32>
    %cst_7 = arith.constant dense<0.000000e+00> : vector<8xf32>
    %11 = vector.multi_reduction <add>, %10, %cst_7 [1] : vector<8x8xf32> to vector<8xf32>
    %12 = vector.shape_cast %11 : vector<8xf32> to vector<8x1xf32>
    %13 = tpu.reciprocal %12 {approx = true} : vector<8x1xf32> -> vector<8x1xf32>
    %14 = vector.broadcast %13 : vector<8x1xf32> to vector<8x8xf32>
    %15 = arith.mulf %10, %14 : vector<8x8xf32>
    %cst_8 = arith.constant dense<0.000000e+00> : vector<8x256xf32>
    %16 = tpu.matmul %15, %2, %cst_8 {dimension_numbers = #tpu.dot_dimension_numbers<[1], [0], [0], [1], [0, 0, 1, 1], [], []>} : vector<8x8xf32>, vector<8x256xf32>, vector<8x256xf32> -> vector<8x256xf32>
    %c0_9 = arith.constant 0 : index
    %c0_10 = arith.constant 0 : index
    %17 = vector.load %arg3[%c0_9, %c0_10] : memref<8x256xf32, #tpu.memory_space<vmem>>, vector<8x256xf32>
    tpu.vector_store %arg3[%c0_9, %c0_10], %16 {strides = array<i32>} : memref<8x256xf32, #tpu.memory_space<vmem>>, vector<8x256xf32>,
    return
  }
}

</mosaic_0001>

<bundles_post_ra>
// kernel: tpu_custom_call.1
= control target key start
LH: loop header
LB: loop body
LE: loop exit
PB: predicated region body
PF: predicated region fallthrough
CT: control target
= control target key end

     0   :  { %8 = vsyncpa [#allocation3], 0  ;;  %s411_s0 = inlined_call_operand.hbm [shape: f32[8,256], index: 0, kind: input, shape index: {}]   ;;  %s412_s1 = inlined_call_operand.hbm [shape: f32[8,256], index: 1, kind: input, shape index: {}]   ;;  %s413_s2 = inlined_call_operand.hbm [shape: f32[8,256], index: 2, kind: input, shape index: {}]   ;;  %s414_s3 = inlined_call_operand.hbm [shape: f32[8,256], index: 3, kind: output, shape index: {}]  }
   0x1   :  { %9 = vsyncpa [#allocation6], 0 }
   0x2   :  { %10 = vsyncpa [#allocation4], 0  ;;  %s335_s12 = smov [#allocation5]   ;;  %s336_s14 = smov [#allocation2]  }
   0x3   :  { %s27_s13 = sshll.u32 %s335_s12, 4  ;;  %s17_s15 = sshll.u32 %s336_s14, 4  ;;  %s28_s13 = int_to_ptr.vmem [resolvable:$true] %s27_s13  ;;  %s18_s15 = int_to_ptr.vmem [resolvable:$true] %s17_s15 }
   0x4   :  { %s241_s18 = scalar_lea.hbm %s412_s1, 256 }
   0x5   :  { %p242_p0 = scmp.ne.s32.totalorder %s412_s1, %s241_s18  ;;  %p245_p1 = scmp.lt.u32.totalorder %s241_s18, %s412_s1 }
   0x7   :  { %p247_p2 = pnand %p245_p1, %p242_p0 }
   0x9   :  { %250 = shalt.err (!%p247_p2)
}
   0xa   :  { %s251_s23 = scalar_lea.vmem %s28_s13, 256  ;;  %p256_p4 = scmp.lt.s32.totalorder %s28_s13, %s28_s13 }
   0xb   :  { %p252_p3 = scmp.ne.s32.totalorder %s28_s13, %s251_s23  ;;  %p257_p5 = scmp.lt.s32.totalorder %s251_s23, %s251_s23 }
   0xd   :  { %p258_p6 = por %p257_p5, %p256_p4 }
   0xf   :  { %p259_p7 = pnand %p258_p6, %p252_p3 }
  0x11   :  { %262 = shalt.err (!%p259_p7)
}
  0x12   :  { %30 = dma.hbm_to_vmem [thread:$0]  %s412_s1, 256, %s28_s13, [#allocation6]  }
  0x13   :  { %s263_s28 = scalar_lea.hbm %s411_s0, 256 }
  0x14   :  { %p264_p8 = scmp.ne.s32.totalorder %s411_s0, %s263_s28  ;;  %p267_p9 = scmp.lt.u32.totalorder %s263_s28, %s411_s0 }
  0x16   :  { %p269_p10 = pnand %p267_p9, %p264_p8 }
  0x18   :  { %272 = shalt.err (!%p269_p10)
}
  0x19   :  { %s273_s6 = scalar_lea.vmem %s18_s15, 256  ;;  %p278_p12 = scmp.lt.s32.totalorder %s18_s15, %s18_s15 }
  0x1a   :  { %p274_p11 = scmp.ne.s32.totalorder %s18_s15, %s273_s6  ;;  %p279_p13 = scmp.lt.s32.totalorder %s273_s6, %s273_s6 }
  0x1c   :  { %p280_p0 = por %p279_p13, %p278_p12 }
  0x1e   :  { %p281_p1 = pnand %p280_p0, %p274_p11 }
  0x20   :  { %284 = shalt.err (!%p281_p1)
}
  0x21   :  { %20 = dma.hbm_to_vmem [thread:$0]  %s411_s0, 256, %s18_s15, [#allocation3]  }
  0x22   :  { %s337_s8 = smov [#allocation7]   ;;  %s285_s12 = scalar_lea.hbm %s413_s2, 256 }
  0x23   :  { %s37_s9 = sshll.u32 %s337_s8, 4  ;;  %p286_p2 = scmp.ne.s32.totalorder %s413_s2, %s285_s12  ;;  %s38_s9 = int_to_ptr.vmem [resolvable:$true] %s37_s9 }
  0x24   :  { %p289_p3 = scmp.lt.u32.totalorder %s285_s12, %s413_s2 }
  0x26   :  { %p291_p4 = pnand %p289_p3, %p286_p2 }
  0x28   :  { %294 = shalt.err (!%p291_p4)
}
  0x29   :  { %s295_s18 = scalar_lea.vmem %s38_s9, 256  ;;  %p300_p6 = scmp.lt.s32.totalorder %s38_s9, %s38_s9 }
  0x2a   :  { %p296_p5 = scmp.ne.s32.totalorder %s38_s9, %s295_s18  ;;  %p301_p7 = scmp.lt.s32.totalorder %s295_s18, %s295_s18 }
  0x2c   :  { %p302_p8 = por %p301_p7, %p300_p6 }
  0x2e   :  { %p303_p9 = pnand %p302_p8, %p296_p5 }
  0x30   :  { %306 = shalt.err (!%p303_p9)
}
  0x31   :  { %40 = dma.hbm_to_vmem [thread:$0]  %s413_s2, 256, %s38_s9, [#allocation6]  }
  0x32   :  { %329 = dma.done.wait [#allocation3], 256  }
  0x33   :  { %330 = vsyncadd [#allocation3], 4294967040 }
  0x34   :  { %331 = dma.done.wait [#allocation6], 512  }
  0x35   :  { %332 = vsyncadd [#allocation6], 4294966784  ;;  %v53_v0 = vld [vmem:[#allocation5 + $0x8] sm:$0xff]  ;;  %v52_v1 = vld [vmem:[#allocation5] sm:$0xff]  ;;  %vm127_vm0 = vcmask 64512   ;;  %v338_v15 = vmov 0.0  }
  0x36   :  { %v51_v2 = vld [vmem:[#allocation2 + $0x8] sm:$0xff]  ;;  %56 = vmatprep.subr.mxu0 %v53_v0  ;;  %v50_v3 = vld [vmem:[#allocation2] sm:$0xff]  ;;  %206 = vmatprep.mubr.f32.mxu1 %v338_v15  ;;  %s339_s2 = smov [#allocation8]  }
  0x37   :  { %120 = vmatprep.mubr.f32.mxu0 %v51_v2  ;;  %57 = vmatpush1.xpose.msra.mxu0 %v52_v1  ;;  %v55_v13 = vld [vmem:[#allocation7 + $0x8] sm:$0xff]  ;;  %v54_v14 = vld [vmem:[#allocation7] sm:$0xff]  ;;  %s221_s19 = sshll.u32 %s339_s2, 4  ;;  %s222_s19 = int_to_ptr.vmem [resolvable:$true] %s221_s19 }
  0x38   :  { %142 = vmatprep.subr.mxu1 %v55_v13  ;;  %s307_s20 = scalar_lea.vmem %s222_s19, 256  ;;  %p312_p11 = scmp.lt.s32.totalorder %s222_s19, %s222_s19 }
  0x39   :  { %143 = vmatpush1.msra.mxu1 %v54_v14  ;;  %p308_p10 = scmp.ne.s32.totalorder %s222_s19, %s307_s20  ;;  %p313_p12 = scmp.lt.s32.totalorder %s307_s20, %s307_s20 }
  0x3a   :  { %121 = vmatmul.mubr.f32.vlgmr.msra.gmra.mrb[0].mxu0 %v50_v3 }
  0x3b   :  { %p314_p13 = por %p313_p12, %p312_p11 }
  0x3d   :  { %p315_p0 = pnand %p314_p13, %p308_p10 }
 0x10d   :  { %v122_v4 = vpop.f32.mrb[0].mxu0 }
 0x10e   :  { %v126_v5 = vmul.f32 16.0, %v122_v4  ;;  %v124_v6 = vpop.f32.mrb[1].mxu0 }
 0x110   :  { %v128_v7 = vsel %vm127_vm0, %v126_v5, -inf }
 0x111   :  { %129 = vmax.xlane.f32.xlu0 %v128_v7 }
 0x19e   :  { %v130_v8 = vpop.xlane.xlu0 %129 }
 0x19f   :  { %v131_v9 = vsub.f32 %v126_v5, %v130_v8 }
 0x1a1   :  { %v132_v10 = vmul.f32 1.442695, %v131_v9 }
 0x1a3   :  { %237 = vpow2.f32 %v132_v10 }
 0x1ad   :  { %v238_v11 = vpop.eup %237 }
 0x1ae   :  { %v134_v12 = vsel %vm127_vm0, %v238_v11, 0.0 }
 0x1af   :  { %135 = vadd.xlane.f32.xlu0 %v134_v12 }
 0x23c   :  { %v136_v16 = vpop.xlane.xlu0 %135 }
 0x23d   :  { %239 = vrcp.f32 %v136_v16 }
 0x247   :  { %v240_v17 = vpop.eup %239 }
 0x248   :  { %v138_v18 = vmul.f32 %v240_v17, %v238_v11 }
 0x24a   :  { %231 = vmatmul.mubr.msk.f32.vlgmr.msra.gmra.mrb[0].mxu1 %vm127_vm0, %v138_v18 }
 0x31d   :  { %v208_v19 = vpop.f32.mrb[0].mxu1 }
 0x31e   :  { %213 = vst [vmem:[#allocation8] sm:$0xff] %v208_v19  ;;  %v210_v20 = vpop.f32.mrb[1].mxu1 }
 0x31f   :  { %214 = vst [vmem:[#allocation8 + $0x8] sm:$0xff] %v210_v20 }
 0x320   :  { %318 = shalt.err (!%p315_p0)
}
 0x321   :  { %s319_s23 = scalar_lea.hbm %s414_s3, 256 }
 0x322   :  { %p320_p1 = scmp.ne.s32.totalorder %s414_s3, %s319_s23  ;;  %p323_p2 = scmp.lt.u32.totalorder %s319_s23, %s414_s3 }
 0x324   :  { %p325_p3 = pnand %p323_p2, %p320_p1 }
 0x326   :  { %328 = shalt.err (!%p325_p3)
}
 0x327   :  { %224 = dma.vmem_to_hbm [thread:$0]  %s222_s19, 256, %s414_s3, [#allocation4]  }
 0x328   :  { %333 = dma.done.wait [#allocation4], 256  }
 0x329   :  { %334 = vsyncadd [#allocation4], 4294967040 }
 0x32a   :  { %228 = vsyncpa [#allocation3], 1 }
 0x32b   :  { %229 = vsyncpa [#allocation6], 1 }
 0x32c   :  { %230 = vsyncpa [#allocation4], 1 }

</bundles_post_ra>
